<compile_context>
chip_gen: v5e
topology: v5e:2x2
jax: 0.10.0
libtpu: 0.0.40
codegen_flags: <defaults>
</compile_context>

<pallas_src>
import functools

import jax
import jax.numpy as jnp
import numpy as np
from jax.experimental import pallas as pl
from jax.experimental.pallas import tpu as pltpu


def residual_kernel(x_ref, w1_ref, w2_ref, o_ref, *, width):
    # x_ref : (1, C, LT)   input block: channels on sublanes, flattened (H,W) positions on lanes
    # w1_ref: (4C, 3C)     fused [1,3] conv weights, tap-major along the contraction
    # w2_ref: (C, 4C)      [1,1] conv weights
    x = x_ref[0]                                     # (C, LT)
    c, lt = x.shape

    h = jnp.maximum(x, 0.0)                          # ReLU (VPU)

    # Position of each lane within its W-row (LT always holds whole W-rows).
    w_pos = jax.lax.broadcasted_iota(jnp.int32, (c, lt), 1) % width

    # Shift the *narrow* input along lanes (XLU roll); mask row edges to realize the
    # zero padding of the [1,3] conv and to stop leakage across H-row / tile boundaries.
    h_prev = jnp.where(w_pos == 0, 0.0, pltpu.roll(h, shift=1, axis=1))               # h[l-1]
    h_next = jnp.where(w_pos == width - 1, 0.0, pltpu.roll(h, shift=lt - 1, axis=1))   # h[l+1]

    # im2col: (3C, LT), rows ordered [tap0 | tap1 | tap2] to match w1_ref's contraction order.
    cols = jnp.concatenate([h_prev, h, h_next], axis=0)

    z1 = jnp.dot(w1_ref[...], cols, preferred_element_type=jnp.float32)    # (4C, LT) conv1
    y2 = jnp.maximum(z1, 0.0)                                              # ReLU
    z2 = jnp.dot(w2_ref[...], y2, preferred_element_type=jnp.float32)      # (C, LT)  conv2

    o_ref[0] = (x + z2).astype(o_ref.dtype)                                # residual add


@functools.partial(jax.jit, static_argnames=("lt",))
def residual_pallas(x_nchw, w1_oihw, w2_oihw, *, lt=None):
    N, C, H, W = x_nchw.shape
    C4 = 4 * C
    L = H * W

    if lt is None:
        lt = L                                       # whole image per step (2 steps for N=2)
    assert L % lt == 0, "lane tile must evenly divide H*W (no silently dropped positions)"
    assert lt % W == 0, "lane tile must contain whole W-rows"
    assert lt == L or lt % 128 == 0, "partial lane tiles must be a multiple of 128 lanes"

    # (N, C, H, W) -> (N, C, H*W): free reshape of contiguous trailing dims, no transpose.
    x3 = x_nchw.reshape(N, C, L)

    # Pre-fuse conv1 weights: (4C, C, 1, 3) -> (4C, 3C), tap-major contraction so row block
    # t*C + c multiplies the im2col row for tap t / channel c.
    w1f = jnp.transpose(w1_oihw[:, :, 0, :], (0, 2, 1)).reshape(C4, 3 * C)
    # conv2 weights: (C, 4C, 1, 1) -> (C, 4C) — already in (out, in) order, no transpose.
    w2m = w2_oihw[:, :, 0, 0]

    out3 = pl.pallas_call(
        functools.partial(residual_kernel, width=W),
        out_shape=jax.ShapeDtypeStruct((N, C, L), x_nchw.dtype),
        grid_spec=pltpu.PrefetchScalarGridSpec(
            num_scalar_prefetch=0,
            grid=(N, L // lt),
            in_specs=[
                pl.BlockSpec((1, C, lt), lambda n, j: (n, 0, j)),
                pl.BlockSpec((C4, 3 * C), lambda n, j: (0, 0)),
                pl.BlockSpec((C, C4), lambda n, j: (0, 0)),
            ],
            out_specs=pl.BlockSpec((1, C, lt), lambda n, j: (n, 0, j)),
        ),
        compiler_params=pltpu.CompilerParams(
            dimension_semantics=("parallel", "parallel")),
    )(x3, w1f, w2m)

    return out3.reshape(N, C, H, W)


def residual_ref(x_nchw, w1_oihw, w2_oihw):
    """Pure-JAX reference matching the PyTorch module semantics."""
    h = jnp.maximum(x_nchw, 0.0)
    z1 = jax.lax.conv_general_dilated(
        h, w1_oihw, window_strides=(1, 1), padding=((0, 0), (1, 1)),
        dimension_numbers=('NCHW', 'OIHW', 'NCHW'))
    y2 = jnp.maximum(z1, 0.0)
    z2 = jax.lax.conv_general_dilated(
        y2, w2_oihw, window_strides=(1, 1), padding=((0, 0), (0, 0)),
        dimension_numbers=('NCHW', 'OIHW', 'NCHW'))
    return x_nchw + z2


if __name__ == "__main__":
    key = jax.random.PRNGKey(0)
    k_x, k_w1, k_w2 = jax.random.split(key, 3)

    N, C, H, W = 2, 4, 8, 16   # small shapes consistent with the module (l_in = C = 4)
    x = jax.random.normal(k_x, (N, C, H, W), dtype=jnp.float32)

    # Deterministic parameter init (PyTorch Conv2d weight shapes, no bias).
    fan1 = C * 1 * 3
    fan2 = 4 * C * 1 * 1
    w1 = jax.random.normal(k_w1, (4 * C, C, 1, 3), dtype=jnp.float32) / np.sqrt(fan1)
    w2 = jax.random.normal(k_w2, (C, 4 * C, 1, 1), dtype=jnp.float32) / np.sqrt(fan2)

    out = residual_pallas(x, w1, w2)
    out = jax.block_until_ready(out)

    ref = residual_ref(x, w1, w2)
    if not np.allclose(np.asarray(out), np.asarray(ref), atol=1e-4, rtol=1e-4):
        raise AssertionError("Pallas kernel output mismatch vs reference")

    print("KERNEL_OK")
</pallas_src>

<mosaic_0001>
module attributes {stable_mosaic.version = 11 : i64} {
  func.func @residual_kernel(%arg0: i32, %arg1: i32, %arg2: memref<1x4x128xf32, #tpu.memory_space<vmem>>, %arg3: memref<16x12xf32, #tpu.memory_space<vmem>>, %arg4: memref<4x16xf32, #tpu.memory_space<vmem>>, %arg5: memref<1x4x128xf32, #tpu.memory_space<vmem>>) attributes {dimension_semantics = [#tpu.dimension_semantics<parallel>, #tpu.dimension_semantics<parallel>], iteration_bounds = array<i64: 2, 1>, scalar_prefetch = 0 : i64, scratch_operands = 0 : i64, tpu.core_type = #tpu.core_type<tc>, window_params = [{transform_indices = @transform_0, window_bounds = array<i64: 1, 4, 128>}, {pipeline_mode = #tpu.pipeline_mode<synchronous>, transform_indices = @transform_1, window_bounds = array<i64: 16, 12>}, {pipeline_mode = #tpu.pipeline_mode<synchronous>, transform_indices = @transform_2, window_bounds = array<i64: 4, 16>}, {transform_indices = @transform_3, window_bounds = array<i64: 1, 4, 128>}]} {
    %c0 = arith.constant 0 : index
    %c0_0 = arith.constant 0 : index
    %c0_1 = arith.constant 0 : index
    %0 = vector.load %arg2[%c0, %c0_0, %c0_1] : memref<1x4x128xf32, #tpu.memory_space<vmem>>, vector<1x4x128xf32>
    %1 = vector.shape_cast %0 : vector<1x4x128xf32> to vector<4x128xf32>
    %cst = arith.constant 0.000000e+00 : f32
    %2 = vector.broadcast %cst : f32 to vector<4x128xf32>
    %3 = arith.maximumf %1, %2 : vector<4x128xf32>
    %4 = tpu.iota {dimensions = array<i32: 1>} : vector<4x128xi32>
    %c16_i32 = arith.constant 16 : i32
    %c0_i32 = arith.constant 0 : i32
    %5 = arith.cmpi eq, %c16_i32, %c0_i32 : i32
    %c1_i32 = arith.constant 1 : i32
    %6 = arith.select %5, %c1_i32, %c16_i32 : i32
    %7 = vector.broadcast %6 : i32 to vector<4x128xi32>
    %8 = arith.remsi %4, %7 : vector<4x128xi32>
    %c0_i32_2 = arith.constant 0 : i32
    %9 = vector.broadcast %c0_i32_2 : i32 to vector<4x128xi32>
    %10 = arith.cmpi ne, %8, %9 : vector<4x128xi32>
    %c0_i32_3 = arith.constant 0 : i32
    %11 = vector.broadcast %c0_i32_3 : i32 to vector<4x128xi32>
    %12 = arith.cmpi slt, %8, %11 : vector<4x128xi32>
    %c0_i32_4 = arith.constant 0 : i32
    %13 = arith.cmpi slt, %6, %c0_i32_4 : i32
    %14 = vector.broadcast %13 : i1 to vector<4x128xi1>
    %15 = vector.broadcast %14 : vector<4x128xi1> to vector<4x128xi1>
    %16 = arith.xori %12, %15 : vector<4x128xi1>
    %17 = arith.andi %16, %10 : vector<4x128xi1>
    %18 = vector.broadcast %6 : i32 to vector<4x128xi32>
    %19 = arith.addi %8, %18 : vector<4x128xi32>
    %20 = arith.select %17, %19, %8 : vector<4x128xi1>, vector<4x128xi32>
    %c0_i32_5 = arith.constant 0 : i32
    %21 = vector.broadcast %c0_i32_5 : i32 to vector<4x128xi32>
    %22 = arith.cmpi eq, %20, %21 : vector<4x128xi32>
    %c1_i32_6 = arith.constant 1 : i32
    %23 = tpu.dynamic_rotate %3 by %c1_i32_6 dim 1 : vector<4x128xf32>, i32 -> vector<4x128xf32>
    %cst_7 = arith.constant 0.000000e+00 : f32
    %24 = vector.broadcast %cst_7 : f32 to vector<4x128xf32>
    %25 = arith.select %22, %24, %23 : vector<4x128xi1>, vector<4x128xf32>
    %c15_i32 = arith.constant 15 : i32
    %26 = vector.broadcast %c15_i32 : i32 to vector<4x128xi32>
    %27 = arith.cmpi eq, %20, %26 : vector<4x128xi32>
    %c127_i32 = arith.constant 127 : i32
    %28 = tpu.dynamic_rotate %3 by %c127_i32 dim 1 : vector<4x128xf32>, i32 -> vector<4x128xf32>
    %cst_8 = arith.constant 0.000000e+00 : f32
    %29 = vector.broadcast %cst_8 : f32 to vector<4x128xf32>
    %30 = arith.select %27, %29, %28 : vector<4x128xi1>, vector<4x128xf32>
    %31 = tpu.concatenate %25, %3, %30 in 0 : vector<4x128xf32>, vector<4x128xf32>, vector<4x128xf32> -> vector<12x128xf32>
    %c0_9 = arith.constant 0 : index
    %c0_10 = arith.constant 0 : index
    %32 = vector.load %arg3[%c0_9, %c0_10] : memref<16x12xf32, #tpu.memory_space<vmem>>, vector<16x12xf32>
    %cst_11 = arith.constant dense<0.000000e+00> : vector<16x128xf32>
    %33 = tpu.matmul %32, %31, %cst_11 {dimension_numbers = #tpu.dot_dimension_numbers<[1], [0], [0], [1], [0, 0, 1, 1], [], []>} : vector<16x12xf32>, vector<12x128xf32>, vector<16x128xf32> -> vector<16x128xf32>
    %cst_12 = arith.constant 0.000000e+00 : f32
    %34 = vector.broadcast %cst_12 : f32 to vector<16x128xf32>
    %35 = arith.maximumf %33, %34 : vector<16x128xf32>
    %c0_13 = arith.constant 0 : index
    %c0_14 = arith.constant 0 : index
    %36 = vector.load %arg4[%c0_13, %c0_14] : memref<4x16xf32, #tpu.memory_space<vmem>>, vector<4x16xf32>
    %cst_15 = arith.constant dense<0.000000e+00> : vector<4x128xf32>
    %37 = tpu.matmul %36, %35, %cst_15 {dimension_numbers = #tpu.dot_dimension_numbers<[1], [0], [0], [1], [0, 0, 1, 1], [], []>} : vector<4x16xf32>, vector<16x128xf32>, vector<4x128xf32> -> vector<4x128xf32>
    %38 = arith.addf %1, %37 : vector<4x128xf32>
    %c0_16 = arith.constant 0 : index
    %c0_17 = arith.constant 0 : index
    %c0_18 = arith.constant 0 : index
    %39 = vector.load %arg5[%c0_16, %c0_17, %c0_18] : memref<1x4x128xf32, #tpu.memory_space<vmem>>, vector<1x4x128xf32>
    %40 = vector.shape_cast %39 : vector<1x4x128xf32> to vector<4x128xf32>
    %41 = vector.shape_cast %38 : vector<4x128xf32> to vector<1x4x128xf32>
    tpu.vector_store %arg5[%c0_16, %c0_17, %c0_18], %41 {strides = array<i32>} : memref<1x4x128xf32, #tpu.memory_space<vmem>>, vector<1x4x128xf32>,
    return
  }
  func.func @transform_0(%arg0: i32, %arg1: i32) -> (i32, i32, i32) {
    %c0_i32 = arith.constant 0 : i32
    %c0_i32_0 = arith.constant 0 : i32
    return %arg0, %c0_i32, %arg1 : i32, i32, i32
  }
  func.func @transform_1(%arg0: i32, %arg1: i32) -> (i32, i32) {
    %c0_i32 = arith.constant 0 : i32
    %c0_i32_0 = arith.constant 0 : i32
    %c0_i32_1 = arith.constant 0 : i32
    return %c0_i32, %c0_i32_0 : i32, i32
  }
  func.func @transform_2(%arg0: i32, %arg1: i32) -> (i32, i32) {
    %c0_i32 = arith.constant 0 : i32
    %c0_i32_0 = arith.constant 0 : i32
    %c0_i32_1 = arith.constant 0 : i32
    return %c0_i32, %c0_i32_0 : i32, i32
  }
  func.func @transform_3(%arg0: i32, %arg1: i32) -> (i32, i32, i32) {
    %c0_i32 = arith.constant 0 : i32
    %c0_i32_0 = arith.constant 0 : i32
    return %arg0, %c0_i32, %arg1 : i32, i32, i32
  }
}

</mosaic_0001>

<bundles_post_ra>
// kernel: residual_pallas.1
= control target key start
LH: loop header
LB: loop body
LE: loop exit
PB: predicated region body
PF: predicated region fallthrough
CT: control target
= control target key end

     0   :  { %s451_s12 = smov 0   ;;  %s453_s13 = smov 0   ;;  %s500_s0 = inlined_call_operand.vmem [shape: f32[2,4,128], index: 0, kind: input, shape index: {}]   ;;  %s501_s1 = inlined_call_operand.vmem [shape: f32[16,12], index: 1, kind: input, shape index: {}]   ;;  %s502_s2 = inlined_call_operand.vmem [shape: f32[4,16], index: 2, kind: input, shape index: {}]   ;;  %s503_s3 = inlined_call_operand.vmem [shape: f32[2,4,128], index: 3, kind: output, shape index: {}]  }
   0x1   :  { %s455_s14 = smov 0  }
   0x2 LB: > { %s25_s15 = sadd.s32 1, %s423_s13  ;;  %p368_p0 = scmp.ge.s32.totalorder %s427_s14, 1  ;;  %s427_s14 = sphi %s455_s14, %s13_s14   ;;  %s423_s13 = sphi %s453_s13, %s505_s13   ;;  %s419_s12 = sphi %s451_s12, %s504_s12  }
   0x3   : > { %p27_p1 = scmp.ge.s32.totalorder %s25_s15, 2  ;;  %p155_p2 = scmp.lt.s32.totalorder %s427_s14, 3 }
   0x5   : > { %s507_s15 = smov (%p27_p1, %s25_s15), 0  ;;  %p156_p3 = pnand %p368_p0, %p155_p2 }
   0x6   : > { %p183_p4 = scmp.lt.s32.totalorder (!%p156_p3), %s419_s12, 1  ;;  %s429_s20 = smov (!%p156_p3), 127  }
   0x7   : > { %159 = sbr.rel (%p156_p3) target bundleno = 410 (0x19a), region = 32  ;;  %s430_s21 = smov (!%p156_p3), 1  }
   0xc   : > { %s509_s12 = smov (!%p183_p4, %s419_s12), 1  ;;  %v199_v2 = vlaneseq  ;;  %vm224_vm1 = vcmask 1043456   ;;  %v227_v10 = vld [vmem:[%s501_s1 + $0x8] sm:$0xff]  ;;  %vm228_vm3 = vcmask 97280   ;;  %v226_v11 = vld [vmem:[%s501_s1] sm:$0xff]  ;;  %vm264_vm4 = vcmask 130048  }
   0xd   : > { %s369_s16 = sshll.u32 %s509_s12, 2  ;;  %v263_v17 = vld [vmem:[%s502_s2] sm:$0xf] }
   0xe   : > { %s189_s19 = scalar_lea.vmem %s500_s0, %s369_s16  ;;  %v200_v3 = vand.u32 127, %v199_v2  ;;  %s196_s30 = scalar_lea.vmem %s503_s3, %s369_s16 }
   0xf   : > { %v197_v0 = vld [vmem:[%s189_s19] sm:$0xf] }
  0x10   : > { %v198_v1 = vmax.f32 %v197_v0, 0.0  ;;  %v205_v4 = vand.u32 15, %v200_v3 }
  0x12   : > { %218 = vrot.lane.b32.xlu0 %v198_v1, %s429_s20  ;;  %vm217_vm0 = vcmp.eq.s32.totalorder %v205_v4, 15  ;;  %vm213_vm2 = vcmp.eq.s32.totalorder %v205_v4, 0  ;;  %v222_v7 = vrot.slane %v198_v1, 4 }
  0x1a   : > { %214 = vrot.lane.b32.xlu0 %v198_v1, %s430_s21 }
  0x84   : > { %v219_v5 = vpop.permute.xlu0 %218 }
  0x85   : > { %v220_v6 = vsel %vm217_vm0, 0.0, %v219_v5 }
  0x86   : > { %371 = vmatpush.msk.msra.mxu0 %vm224_vm1, %v220_v6  ;;  %377 = vmatpush.msk.msra.mxu2 %vm224_vm1, %v220_v6 }
  0x8c   : > { %v215_v8 = vpop.permute.xlu0 %214 }
  0x8d   : > { %v216_v9 = vsel %vm213_vm2, 0.0, %v215_v8 }
  0x8e   : > { %v225_v12 = vsel %vm224_vm1, %v216_v9, %v222_v7 }
  0x8f   : > { %253 = vmatpush.msra.mxu0 %v225_v12  ;;  %378 = vmatpush.msra.mxu2 %v225_v12 }
  0x90   : > { %373 = vmatmul.msk.f32.vlgmr.msra.gmra.mxu2 %vm228_vm3, %v227_v10  ;;  %372 = vmatmul.msk.f32.vlgmr.msra.gmra.mxu0 %vm228_vm3, %v226_v11 }
 0x10d   : > { %v255_v13 = vpop.f32.mrf.mxu0 }
 0x10e   : > { %v261_v16 = vmax.f32 %v255_v13, 0.0 }
 0x113   : > { %v258_v14 = vpop.f32.mrf.mxu2 }
 0x114   : > { %v262_v15 = vmax.f32 %v258_v14, 0.0 }
 0x116   : > { %282 = vmatpush.msra.mxu1 %v262_v15 }
 0x118   : > { %283 = vmatpush.msra.mxu1 %v261_v16 }
 0x119   : > { %374 = vmatmul.msk.f32.vlgmr.msra.gmra.mxu1 %vm264_vm4, %v263_v17 }
 0x196   : > { %v285_v18 = vpop.f32.mrf.mxu1 }
 0x197   : > { %v288_v19 = vadd.f32 %v285_v18, %v197_v0 }
 0x199   : > { %289 = vst [vmem:[%s196_s30] sm:$0xf] %v288_v19 }
 0x19a PF: > { %s13_s14 = sadd.s32 1, %s427_s14   ;;  %s504_s12 = smov %s423_s13 }
 0x19b   : > { %p10_p5 = scmp.ge.s32.totalorder %s13_s14, 4   ;;  %s505_s13 = smov %s507_s15 }
 0x19d   :  { %12 = sbr.rel (!%p10_p5) target bundleno = 2 (0x2), region = 62 }

</bundles_post_ra>
